<compile_context>
chip_gen: v5e
topology: v5e:2x2
jax: 0.10.0
libtpu: 0.0.40
codegen_flags: <defaults>
</compile_context>

<pallas_src>
import numpy as np
import jax
import jax.numpy as jnp
from jax.experimental import pallas as pl
from jax.experimental.pallas import tpu as pltpu


def _round_up(x, m):
    return ((x + m - 1) // m) * m


def _vmem_cap_bytes():
    """Conservative scoped-VMEM cap per chip generation."""
    try:
        kind = jax.devices()[0].device_kind.lower()
    except Exception:
        kind = ""
    if "v5" in kind or "v6" in kind:
        return 100 << 20          # 128 MiB physical on v5e/v6e
    return 48 << 20               # v7x: 64 MiB/TC physical -> leave headroom


def _plan_ch(C, H, th):
    """Padded (Cp, Hp) and hidden tile TH; all multiples of 128, TH | Hp."""
    Cp = _round_up(C, 128)
    Hp = _round_up(H, 128)
    th = max(128, (th // 128) * 128)
    if Hp <= th:
        TH = Hp
    else:
        TH = 0
        for cand in range(th, 127, -128):       # largest 128-multiple divisor
            if Hp % cand == 0:
                TH = cand
                break
        if TH == 0:                             # no divisor <= th: pad Hp up
            TH = th
            Hp = _round_up(Hp, TH)
    return Cp, Hp, TH


def _pad_cast(a, shape, dtype):
    """Zero-pad `a` to `shape` and cast; no-op if already padded + cast."""
    if a.shape == shape and a.dtype == dtype:
        return a
    out = jnp.zeros(shape, dtype)
    return out.at[tuple(slice(0, s) for s in a.shape)].set(a.astype(dtype))


def prepare_params(w1, b1, w2, b2, *, compute_dtype=jnp.bfloat16, th=512):
    """Pad + cast FFN parameters once (hoists padding out of the call path)."""
    C, H = w1.shape
    Cp, Hp, _ = _plan_ch(C, H, th)
    return (_pad_cast(w1, (Cp, Hp), compute_dtype),
            _pad_cast(b1.reshape(1, -1), (1, Hp), jnp.float32),
            _pad_cast(w2, (Hp, Cp), compute_dtype),
            _pad_cast(b2.reshape(1, -1), (1, Cp), jnp.float32))


def _ffn_kernel(x_ref, w1_ref, b1_ref, w2_ref, b2_ref, o_ref, acc_ref):
    # x:  [TM, Cp] bf16   w1: [Cp, TH] bf16   b1: [1, TH] f32
    # w2: [TH, Cp] bf16   b2: [1, Cp]  f32    o: [TM, Cp]   acc: [TM, Cp] f32
    h_idx = pl.program_id(1)

    @pl.when(h_idx == 0)
    def _():
        acc_ref[...] = jnp.zeros_like(acc_ref)

    # First linear (this H slab): MXU matmul with f32 accumulation,
    # bias + ReLU on the VPU in f32.
    h = jnp.dot(x_ref[...], w1_ref[...], preferred_element_type=jnp.float32)
    h = jnp.maximum(h + b1_ref[...], 0.0)
    # Second linear: partial contribution of this H slab, accumulated in f32.
    acc_ref[...] += jnp.dot(h.astype(w2_ref.dtype), w2_ref[...],
                            preferred_element_type=jnp.float32)

    @pl.when(h_idx == pl.num_programs(1) - 1)
    def _():
        # Dropout in eval mode == identity.
        o_ref[...] = (acc_ref[...] + b2_ref[...]).astype(o_ref.dtype)


def feed_forward(x, w1, b1, w2, b2, *, tm=512, th=512,
                 compute_dtype=jnp.bfloat16, out_dtype=None,
                 vmem_limit_bytes=None):
    """x: [T, C].  Params may be raw ([C,H]/[H]/[H,C]/[C]) or pre-padded via
    prepare_params().  Returns [T, C] in out_dtype (default x.dtype)."""
    T, C = x.shape
    out_dtype = x.dtype if out_dtype is None else out_dtype
    Cp, Hp, TH = _plan_ch(C, w1.shape[1], th)

    # Row tile: multiple of 8 sublanes; even grid-step count over T when >1
    # so the "parallel" axis splits evenly across v7x's two TensorCores.
    TM = min(max(8, (tm // 8) * 8), _round_up(T, 8))
    Tp = _round_up(T, TM)
    steps_t = Tp // TM
    if steps_t > 1 and steps_t % 2 == 1:
        Tp += TM
        steps_t += 1
    steps_h = Hp // TH

    # Pad + cast (skipped entirely when params were prepared once at init).
    w1p = _pad_cast(w1, (Cp, Hp), compute_dtype)
    b1p = _pad_cast(b1.reshape(1, -1), (1, Hp), jnp.float32)
    w2p = _pad_cast(w2, (Hp, Cp), compute_dtype)
    b2p = _pad_cast(b2.reshape(1, -1), (1, Cp), jnp.float32)
    xp = _pad_cast(x, (Tp, Cp), compute_dtype)

    cdt_isz = np.dtype(compute_dtype).itemsize
    out_isz = np.dtype(out_dtype).itemsize

    if vmem_limit_bytes is None:
        est = (2 * (Cp * TH + TH * Cp) * cdt_isz   # double-buffered w1/w2 slabs
               + 2 * (TH + Cp) * 4                  # bias slabs
               + 2 * TM * Cp * cdt_isz              # x tiles
               + 2 * TM * Cp * out_isz              # out tiles
               + TM * Cp * 4                        # f32 accumulator scratch
               + TM * TH * 4)                       # hidden intermediate
        vmem_limit_bytes = min(max(int(est * 1.3), 32 << 20), _vmem_cap_bytes())

    cost = pl.CostEstimate(
        flops=4 * Tp * Cp * Hp,
        transcendentals=0,
        bytes_accessed=(Tp * Cp * (cdt_isz + out_isz)
                        + 2 * Cp * Hp * cdt_isz + (Hp + Cp) * 4))

    out = pl.pallas_call(
        _ffn_kernel,
        out_shape=jax.ShapeDtypeStruct((Tp, Cp), out_dtype),
        grid_spec=pltpu.PrefetchScalarGridSpec(
            num_scalar_prefetch=0,
            grid=(steps_t, steps_h),
            in_specs=[
                pl.BlockSpec((TM, Cp), lambda i, h: (i, 0)),   # x: resident over h
                pl.BlockSpec((Cp, TH), lambda i, h: (0, h)),   # w1 column slab
                pl.BlockSpec((1, TH),  lambda i, h: (0, h)),   # b1 slab
                pl.BlockSpec((TH, Cp), lambda i, h: (h, 0)),   # w2 row slab
                pl.BlockSpec((1, Cp),  lambda i, h: (0, 0)),   # b2 (constant)
            ],
            out_specs=pl.BlockSpec((TM, Cp), lambda i, h: (i, 0)),
            scratch_shapes=[pltpu.VMEM((TM, Cp), jnp.float32)],
        ),
        compiler_params=pltpu.CompilerParams(
            dimension_semantics=("parallel", "arbitrary"),
            vmem_limit_bytes=vmem_limit_bytes),
        cost_estimate=cost,
    )(xp, w1p, b1p, w2p, b2p)

    return out[:T, :C]


def _ref(x, w1, b1, w2, b2):
    return jnp.maximum(x @ w1 + b1.reshape(1, -1), 0.0) @ w2 + b2.reshape(1, -1)


if __name__ == "__main__":
    key = jax.random.PRNGKey(0)
    ks = jax.random.split(key, 12)

    # ---- Test 1: small shapes, single grid step -----------------------------
    T, n_embd, ff_hd = 8, 32, 64
    x = jax.random.normal(ks[0], (T, n_embd), dtype=jnp.float32)
    w1 = jax.random.uniform(ks[1], (n_embd, ff_hd), jnp.float32,
                            -1.0 / jnp.sqrt(n_embd), 1.0 / jnp.sqrt(n_embd))
    b1 = jax.random.uniform(ks[2], (ff_hd,), jnp.float32,
                            -1.0 / jnp.sqrt(n_embd), 1.0 / jnp.sqrt(n_embd))
    w2 = jax.random.uniform(ks[3], (ff_hd, n_embd), jnp.float32,
                            -1.0 / jnp.sqrt(ff_hd), 1.0 / jnp.sqrt(ff_hd))
    b2 = jax.random.uniform(ks[4], (n_embd,), jnp.float32,
                            -1.0 / jnp.sqrt(ff_hd), 1.0 / jnp.sqrt(ff_hd))

    out = jax.block_until_ready(feed_forward(x, w1, b1, w2, b2))
    ref = _ref(x, w1, b1, w2, b2)
    assert out.shape == (T, n_embd)
    assert jnp.allclose(out, ref, atol=3e-2, rtol=3e-2), \
        float(jnp.max(jnp.abs(out - ref)))

    # ---- Test 2: multi-step T grid (non-multiple T), even-step balancing ----
    T2 = 300
    x2 = jax.random.normal(ks[5], (T2, n_embd), dtype=jnp.float32)
    out2 = jax.block_until_ready(feed_forward(x2, w1, b1, w2, b2, tm=128))
    ref2 = _ref(x2, w1, b1, w2, b2)
    assert out2.shape == (T2, n_embd)
    assert jnp.allclose(out2, ref2, atol=3e-2, rtol=3e-2), \
        float(jnp.max(jnp.abs(out2 - ref2)))

    # ---- Test 3: pre-padded params (padding hoisted out of the call) --------
    prep = prepare_params(w1, b1, w2, b2)
    out3 = jax.block_until_ready(feed_forward(x, *prep))
    assert jnp.allclose(out3, ref, atol=3e-2, rtol=3e-2), \
        float(jnp.max(jnp.abs(out3 - ref)))

    # ---- Test 4: H-tiled reduction path (multiple h steps, odd dims) --------
    T4, C4, H4 = 72, 48, 320
    x4 = jax.random.normal(ks[6], (T4, C4), dtype=jnp.float32)
    w14 = jax.random.uniform(ks[7], (C4, H4), jnp.float32,
                             -1.0 / jnp.sqrt(C4), 1.0 / jnp.sqrt(C4))
    b14 = jax.random.uniform(ks[8], (H4,), jnp.float32,
                             -1.0 / jnp.sqrt(C4), 1.0 / jnp.sqrt(C4))
    w24 = jax.random.uniform(ks[9], (H4, C4), jnp.float32,
                             -1.0 / jnp.sqrt(H4), 1.0 / jnp.sqrt(H4))
    b24 = jax.random.uniform(ks[10], (C4,), jnp.float32,
                             -1.0 / jnp.sqrt(H4), 1.0 / jnp.sqrt(H4))
    out4 = jax.block_until_ready(feed_forward(x4, w14, b14, w24, b24, th=128))
    ref4 = _ref(x4, w14, b14, w24, b24)
    assert out4.shape == (T4, C4)
    assert jnp.allclose(out4, ref4, atol=5e-2, rtol=5e-2), \
        float(jnp.max(jnp.abs(out4 - ref4)))

    print("KERNEL_OK")
</pallas_src>

<mosaic_0001>
module attributes {stable_mosaic.version = 11 : i64} {
  func.func @_ffn_kernel(%arg0: i32, %arg1: i32, %arg2: memref<8x128xbf16, #tpu.memory_space<vmem>>, %arg3: memref<128x128xbf16, #tpu.memory_space<vmem>>, %arg4: memref<1x128xf32, #tpu.memory_space<vmem>>, %arg5: memref<128x128xbf16, #tpu.memory_space<vmem>>, %arg6: memref<1x128xf32, #tpu.memory_space<vmem>>, %arg7: memref<8x128xf32, #tpu.memory_space<vmem>>, %arg8: memref<8x128xf32, #tpu.memory_space<vmem>>) attributes {dimension_semantics = [#tpu.dimension_semantics<parallel>, #tpu.dimension_semantics<arbitrary>], iteration_bounds = array<i64: 1, 1>, scalar_prefetch = 0 : i64, scratch_operands = 1 : i64, tpu.core_type = #tpu.core_type<tc>, window_params = [{transform_indices = @transform_0, window_bounds = array<i64: 8, 128>}, {transform_indices = @transform_1, window_bounds = array<i64: 128, 128>}, {transform_indices = @transform_2, window_bounds = array<i64: 1, 128>}, {transform_indices = @transform_3, window_bounds = array<i64: 128, 128>}, {pipeline_mode = #tpu.pipeline_mode<synchronous>, transform_indices = @transform_4, window_bounds = array<i64: 1, 128>}, {transform_indices = @transform_5, window_bounds = array<i64: 8, 128>}]} {
    %c0_i32 = arith.constant 0 : i32
    %0 = arith.cmpi eq, %arg1, %c0_i32 : i32
    %1 = arith.extui %0 : i1 to i32
    %c0_i32_0 = arith.constant 0 : i32
    %2 = arith.cmpi ne, %1, %c0_i32_0 : i32
    scf.if %2 {
      %cst_16 = arith.constant 0.000000e+00 : f32
      %20 = vector.broadcast %cst_16 : f32 to vector<8x128xf32>
      %c0_17 = arith.constant 0 : index
      %c0_18 = arith.constant 0 : index
      %21 = vector.load %arg8[%c0_17, %c0_18] : memref<8x128xf32, #tpu.memory_space<vmem>>, vector<8x128xf32>
      tpu.vector_store %arg8[%c0_17, %c0_18], %20 {strides = array<i32>} : memref<8x128xf32, #tpu.memory_space<vmem>>, vector<8x128xf32>,
    } else {
    }
    %c0 = arith.constant 0 : index
    %c0_1 = arith.constant 0 : index
    %3 = vector.load %arg2[%c0, %c0_1] : memref<8x128xbf16, #tpu.memory_space<vmem>>, vector<8x128xbf16>
    %c0_2 = arith.constant 0 : index
    %c0_3 = arith.constant 0 : index
    %4 = vector.load %arg3[%c0_2, %c0_3] : memref<128x128xbf16, #tpu.memory_space<vmem>>, vector<128x128xbf16>
    %cst = arith.constant dense<0.000000e+00> : vector<8x128xf32>
    %5 = tpu.matmul %3, %4, %cst {dimension_numbers = #tpu.dot_dimension_numbers<[1], [0], [0], [1], [0, 0, 1, 1], [], []>} : vector<8x128xbf16>, vector<128x128xbf16>, vector<8x128xf32> -> vector<8x128xf32>
    %c0_4 = arith.constant 0 : index
    %c0_5 = arith.constant 0 : index
    %6 = vector.load %arg4[%c0_4, %c0_5] : memref<1x128xf32, #tpu.memory_space<vmem>>, vector<1x128xf32>
    %7 = vector.broadcast %6 : vector<1x128xf32> to vector<8x128xf32>
    %8 = arith.addf %5, %7 : vector<8x128xf32>
    %cst_6 = arith.constant 0.000000e+00 : f32
    %9 = vector.broadcast %cst_6 : f32 to vector<8x128xf32>
    %10 = arith.maximumf %8, %9 : vector<8x128xf32>
    %c0_7 = arith.constant 0 : index
    %c0_8 = arith.constant 0 : index
    %11 = vector.load %arg8[%c0_7, %c0_8] : memref<8x128xf32, #tpu.memory_space<vmem>>, vector<8x128xf32>
    %12 = arith.truncf %10 : vector<8x128xf32> to vector<8x128xbf16>
    %c0_9 = arith.constant 0 : index
    %c0_10 = arith.constant 0 : index
    %13 = vector.load %arg5[%c0_9, %c0_10] : memref<128x128xbf16, #tpu.memory_space<vmem>>, vector<128x128xbf16>
    %cst_11 = arith.constant dense<0.000000e+00> : vector<8x128xf32>
    %14 = tpu.matmul %12, %13, %cst_11 {dimension_numbers = #tpu.dot_dimension_numbers<[1], [0], [0], [1], [0, 0, 1, 1], [], []>} : vector<8x128xbf16>, vector<128x128xbf16>, vector<8x128xf32> -> vector<8x128xf32>
    %15 = arith.addf %11, %14 : vector<8x128xf32>
    %c0_12 = arith.constant 0 : index
    %c0_13 = arith.constant 0 : index
    %16 = vector.load %arg8[%c0_12, %c0_13] : memref<8x128xf32, #tpu.memory_space<vmem>>, vector<8x128xf32>
    tpu.vector_store %arg8[%c0_12, %c0_13], %15 {strides = array<i32>} : memref<8x128xf32, #tpu.memory_space<vmem>>, vector<8x128xf32>,
    %c0_i32_14 = arith.constant 0 : i32
    %17 = arith.cmpi eq, %arg1, %c0_i32_14 : i32
    %18 = arith.extui %17 : i1 to i32
    %c0_i32_15 = arith.constant 0 : i32
    %19 = arith.cmpi ne, %18, %c0_i32_15 : i32
    scf.if %19 {
      %c0_16 = arith.constant 0 : index
      %c0_17 = arith.constant 0 : index
      %20 = vector.load %arg8[%c0_16, %c0_17] : memref<8x128xf32, #tpu.memory_space<vmem>>, vector<8x128xf32>
      %c0_18 = arith.constant 0 : index
      %c0_19 = arith.constant 0 : index
      %21 = vector.load %arg6[%c0_18, %c0_19] : memref<1x128xf32, #tpu.memory_space<vmem>>, vector<1x128xf32>
      %22 = vector.broadcast %21 : vector<1x128xf32> to vector<8x128xf32>
      %23 = arith.addf %20, %22 : vector<8x128xf32>
      %c0_20 = arith.constant 0 : index
      %c0_21 = arith.constant 0 : index
      %24 = vector.load %arg7[%c0_20, %c0_21] : memref<8x128xf32, #tpu.memory_space<vmem>>, vector<8x128xf32>
      tpu.vector_store %arg7[%c0_20, %c0_21], %23 {strides = array<i32>} : memref<8x128xf32, #tpu.memory_space<vmem>>, vector<8x128xf32>,
    } else {
    }
    return
  }
  func.func @transform_0(%arg0: i32, %arg1: i32) -> (i32, i32) {
    %c0_i32 = arith.constant 0 : i32
    %c0_i32_0 = arith.constant 0 : i32
    return %arg0, %c0_i32 : i32, i32
  }
  func.func @transform_1(%arg0: i32, %arg1: i32) -> (i32, i32) {
    %c0_i32 = arith.constant 0 : i32
    %c0_i32_0 = arith.constant 0 : i32
    return %c0_i32, %arg1 : i32, i32
  }
  func.func @transform_2(%arg0: i32, %arg1: i32) -> (i32, i32) {
    %c0_i32 = arith.constant 0 : i32
    %c0_i32_0 = arith.constant 0 : i32
    return %c0_i32, %arg1 : i32, i32
  }
  func.func @transform_3(%arg0: i32, %arg1: i32) -> (i32, i32) {
    %c0_i32 = arith.constant 0 : i32
    %c0_i32_0 = arith.constant 0 : i32
    return %arg1, %c0_i32 : i32, i32
  }
  func.func @transform_4(%arg0: i32, %arg1: i32) -> (i32, i32) {
    %c0_i32 = arith.constant 0 : i32
    %c0_i32_0 = arith.constant 0 : i32
    %c0_i32_1 = arith.constant 0 : i32
    return %c0_i32, %c0_i32_0 : i32, i32
  }
  func.func @transform_5(%arg0: i32, %arg1: i32) -> (i32, i32) {
    %c0_i32 = arith.constant 0 : i32
    %c0_i32_0 = arith.constant 0 : i32
    return %arg0, %c0_i32 : i32, i32
  }
}

</mosaic_0001>

<bundles_post_ra>
// kernel: tpu_custom_call.1
= control target key start
LH: loop header
LB: loop body
LE: loop exit
PB: predicated region body
PF: predicated region fallthrough
CT: control target
= control target key end

     0   :  { %10 = vsyncpa [#allocation4], 0  ;;  %s507_s0 = inlined_call_operand.hbm [shape: bf16[8,128], index: 0, kind: input, shape index: {}]   ;;  %s508_s1 = inlined_call_operand.hbm [shape: bf16[128,128], index: 1, kind: input, shape index: {}]   ;;  %s509_s2 = inlined_call_operand.vmem [shape: f32[1,128], index: 2, kind: input, shape index: {}]   ;;  %s510_s3 = inlined_call_operand.hbm [shape: bf16[128,128], index: 3, kind: input, shape index: {}]   ;;  %s511_s4 = inlined_call_operand.vmem [shape: f32[1,128], index: 4, kind: input, shape index: {}]   ;;  %s512_s5 = inlined_call_operand.hbm [shape: f32[8,128], index: 5, kind: output, shape index: {}]  }
   0x1   :  { %11 = vsyncpa [#allocation7], 0  ;;  %s28_s20 = sshll.u32 %s508_s1, 4  ;;  %s29_s20 = int_to_ptr.hbm [resolvable:$true] %s28_s20 }
   0x2   :  { %12 = vsyncpa [#allocation5], 0  ;;  %s453_s21 = smov [#allocation6]   ;;  %s18_s25 = sshll.u32 %s507_s0, 4  ;;  %s19_s25 = int_to_ptr.hbm [resolvable:$true] %s18_s25 }
   0x3   :  { %s30_s22 = sshll.u32 %s453_s21, 4  ;;  %s454_s26 = smov 64   ;;  %s31_s22 = int_to_ptr.vmem [resolvable:$true] %s30_s22 }
   0x4   :  { %s455_s27 = smov 4   ;;  %s456_s28 = smov [#allocation3]  }
   0x5   :  { %36 = dma.hbm_to_vmem [thread:$0]  %s29_s20, 1024, %s31_s22, [#allocation7], %s454_s26, %s454_s26, %s455_s27  }
   0x6   :  { %s20_s29 = sshll.u32 %s456_s28, 4  ;;  %s43_s7 = sshll.u32 %s510_s3, 4  ;;  %s21_s29 = int_to_ptr.vmem [resolvable:$true] %s20_s29  ;;  %s44_s7 = int_to_ptr.hbm [resolvable:$true] %s43_s7 }
   0x7   :  { %23 = dma.hbm_to_vmem [thread:$0]  %s19_s25, 64, %s21_s29, [#allocation4]  }
   0x8   :  { %s457_s1 = smov [#allocation8]  }
   0x9   :  { %s45_s8 = sshll.u32 %s457_s1, 4  ;;  %s46_s8 = int_to_ptr.vmem [resolvable:$true] %s45_s8 }
   0xa   :  { %51 = dma.hbm_to_vmem [thread:$0]  %s44_s7, 1024, %s46_s8, [#allocation7], %s454_s26, %s454_s26, %s455_s27  }
   0xb   :  { %447 = dma.done.wait [#allocation4], 64  }
   0xc   :  { %448 = vsyncadd [#allocation4], 4294967232 }
   0xd   :  { %449 = dma.done.wait [#allocation7], 2048  }
   0xe   :  { %450 = vsyncadd [#allocation7], 4294965248  ;;  %v334_v0 = vld [vmem:[#allocation6 + $0x38] sm:$0xff]  ;;  %v333_v1 = vld [vmem:[#allocation6 + $0x30] sm:$0xff]  ;;  %s458_s11 = smov [#allocation9]   ;;  %s252_s15 = sshll.u32 %s512_s5, 4  ;;  %s253_s15 = int_to_ptr.hbm [resolvable:$true] %s252_s15 }
   0xf   :  { %140 = vmatpush.bf16.msra.mxu0 %v334_v0  ;;  %v342_v2 = vld [vmem:[#allocation8 + $0x38] sm:$0xff]  ;;  %v341_v3 = vld [vmem:[#allocation8 + $0x30] sm:$0xff]  ;;  %v332_v4 = vld [vmem:[#allocation6 + $0x28] sm:$0xff]  ;;  %s250_s12 = sshll.u32 %s458_s11, 4  ;;  %s251_s12 = int_to_ptr.vmem [resolvable:$true] %s250_s12 }
  0x10   :  { %220 = vmatpush.bf16.msra.mxu1 %v342_v2  ;;  %v340_v5 = vld [vmem:[#allocation8 + $0x28] sm:$0xff]  ;;  %v331_v6 = vld [vmem:[#allocation6 + $0x20] sm:$0xff]  ;;  %v330_v8 = vld [vmem:[#allocation6 + $0x18] sm:$0xff] }
  0x11   :  { %v339_v7 = vld [vmem:[#allocation8 + $0x20] sm:$0xff]  ;;  %v338_v9 = vld [vmem:[#allocation8 + $0x18] sm:$0xff]  ;;  %v329_v10 = vld [vmem:[#allocation6 + $0x10] sm:$0xff] }
  0x12   :  { %v337_v11 = vld [vmem:[#allocation8 + $0x10] sm:$0xff]  ;;  %v328_v12 = vld [vmem:[#allocation6 + $0x8] sm:$0xff]  ;;  %v327_v13 = vld [vmem:[#allocation6] sm:$0xff] }
  0x13   :  { %141 = vmatpush.bf16.msra.mxu0 %v333_v1  ;;  %v71_v14 = vld [vmem:[#allocation3] sm:$0xf]  ;;  %v336_v15 = vld [vmem:[#allocation8 + $0x8] sm:$0xff]  ;;  %v335_v16 = vld [vmem:[#allocation8] sm:$0xff] }
  0x14   :  { %221 = vmatpush.bf16.msra.mxu1 %v341_v3  ;;  %v349_v17 = vld [vmem:[%s509_s2] ss:$0 sm:$0xff] }
  0x15   :  { %v350_v23 = vld [vmem:[%s511_s4] ss:$0 sm:$0xff] }
  0x17   :  { %142 = vmatpush.bf16.msra.mxu0 %v332_v4 }
  0x18   :  { %222 = vmatpush.bf16.msra.mxu1 %v340_v5 }
  0x1b   :  { %143 = vmatpush.bf16.msra.mxu0 %v331_v6 }
  0x1c   :  { %223 = vmatpush.bf16.msra.mxu1 %v339_v7 }
  0x1f   :  { %144 = vmatpush.bf16.msra.mxu0 %v330_v8 }
  0x20   :  { %224 = vmatpush.bf16.msra.mxu1 %v338_v9 }
  0x23   :  { %145 = vmatpush.bf16.msra.mxu0 %v329_v10 }
  0x24   :  { %225 = vmatpush.bf16.msra.mxu1 %v337_v11 }
  0x27   :  { %146 = vmatpush.bf16.msra.mxu0 %v328_v12 }
  0x28   :  { %226 = vmatpush.bf16.msra.mxu1 %v336_v15 }
  0x2b   :  { %147 = vmatpush.bf16.msra.mxu0 %v327_v13 }
  0x2c   :  { %227 = vmatpush.bf16.msra.mxu1 %v335_v16 }
  0x2e   :  { %148 = vmatmul.bf16.vlgmr.msra.gmra.mxu0 %v71_v14 }
  0xab   :  { %v149_v18 = vpop.f32.mrf.mxu0 }
  0xac   :  { %v150_v19 = vadd.f32 %v349_v17, %v149_v18 }
  0xae   :  { %v153_v20 = vmax.f32 %v150_v19, 0.0 }
  0xb0   :  { %v155_v21 = vpack.c.bf16 %v153_v20, %v153_v20 }
  0xb2   :  { %228 = vmatmul.bf16.vlgmr.msra.gmra.mxu1 %v155_v21 }
  0xb3   :  { %v151_v22 = vpop.f32.mrf.mxu0 }
 0x12f   :  { %v229_v24 = vpop.f32.mrf.mxu1 }
 0x130   :  { %v243_v25 = vadd.f32 %v350_v23, %v229_v24 }
 0x132   :  { %244 = vst [vmem:[#allocation9] sm:$0xff] %v243_v25 }
 0x133   :  { %255 = dma.vmem_to_hbm [thread:$0]  %s251_s12, 128, %s253_s15, [#allocation5]  }
 0x137   :  { %v231_v26 = vpop.f32.mrf.mxu1 }
 0x138   :  { %451 = dma.done.wait [#allocation5], 128  }
 0x139   :  { %452 = vsyncadd [#allocation5], 4294967168 }
 0x13a   :  { %260 = vsyncpa [#allocation4], 1 }
 0x13b   :  { %261 = vsyncpa [#allocation7], 1 }
 0x13c   :  { %262 = vsyncpa [#allocation5], 1 }

</bundles_post_ra>
